<compile_context>
chip_gen: v5e
topology: v5e:2x2
jax: 0.10.0
libtpu: 0.0.40
codegen_flags: <defaults>
</compile_context>

<pallas_src>
import jax
import jax.numpy as jnp
from jax.experimental import pallas as pl
from jax.experimental.pallas import tpu as pltpu


def linear_kernel(x_ref, w_ref, b_ref, o_ref):
    # x_ref: (tile_n, F) VMEM   w_ref: (1, F) VMEM   b_ref: (1,) SMEM
    # o_ref: (tile_n, 1) VMEM
    x = x_ref[...]
    w = w_ref[...]                                  # (1, F): broadcasts over sublanes
    # VPU elementwise multiply + XLU cross-lane reduce, f32 accumulate.
    y = jnp.sum(x * w, axis=-1, keepdims=True)      # (tile_n, 1) f32
    o_ref[...] = (y + b_ref[0]).astype(o_ref.dtype)


def _pick_tile_n(n_rows, n_feat, *, max_tile_rows, target_block_bytes,
                 vmem_budget_bytes):
    """Row tile sized by bytes: ~target_block_bytes of x per buffer, with the
    double-buffered x block, the lane-padded output block (128 lanes -> 512 B
    per row per buffer) and the resident weight all inside vmem_budget_bytes."""
    bytes_per_row_x = n_feat * 4                    # f32 input row
    bytes_per_row_out = 128 * 4                     # (tile_n,1) pads to 128 lanes
    w_bytes = 8 * (((n_feat + 127) // 128) * 128) * 4   # (1,F) pads to 8 sublanes

    by_target = max(8, target_block_bytes // bytes_per_row_x)
    by_vmem = max(
        8,
        (vmem_budget_bytes - w_bytes) // (2 * (bytes_per_row_x + bytes_per_row_out)),
    )
    tile = min(max_tile_rows, by_target, by_vmem)

    # Guarantee >= 4 grid steps when the batch allows it so the "parallel"
    # grid axis can shard across both v7x TensorCores.
    if n_rows >= 4 * 8:
        tile = min(tile, max(8, n_rows // 4))

    tile = max(8, (tile // 8) * 8)                  # sublane (8) aligned
    n_up8 = ((n_rows + 7) // 8) * 8                 # never exceed the array itself
    return min(tile, n_up8)


def linear_forward(x, w, b, *, max_tile_rows=32768, target_block_bytes=4 << 20,
                   vmem_budget_bytes=40 << 20):
    """x: (N, F) f32, w: (1, F) f32 (PyTorch nn.Linear weight), b: (1,) f32 -> (N, 1) f32."""
    N, F = x.shape
    assert w.shape == (1, F) and b.shape == (1,)

    tile_n = _pick_tile_n(
        N, F,
        max_tile_rows=max_tile_rows,
        target_block_bytes=target_block_bytes,
        vmem_budget_bytes=vmem_budget_bytes,
    )
    num_tiles = pl.cdiv(N, tile_n)                  # non-divisible grid: no padding pass

    # Memory-bound cost model for XLA scheduling around the custom call.
    cost = pl.CostEstimate(
        flops=2 * N * F,
        transcendentals=0,
        bytes_accessed=4 * (N * F + F + N + 1),
    )

    y = pl.pallas_call(
        linear_kernel,
        out_shape=jax.ShapeDtypeStruct((N, 1), jnp.float32),
        grid=(num_tiles,),
        in_specs=[
            pl.BlockSpec((tile_n, F), lambda i: (i, 0)),            # x row tile (pipelined)
            pl.BlockSpec((1, F), lambda i: (0, 0)),                 # weight, resident
            pl.BlockSpec(memory_space=pltpu.MemorySpace.SMEM),      # bias scalar in SMEM
        ],
        out_specs=pl.BlockSpec((tile_n, 1), lambda i: (i, 0)),
        compiler_params=pltpu.CompilerParams(
            dimension_semantics=("parallel",),
            vmem_limit_bytes=48 << 20,
        ),
        cost_estimate=cost,
    )(x, w, b)
    return y


def _reference(x, w, b):
    # Plain-JAX reference for y = x @ w.T + b, computed elementwise in f32 so
    # it matches the kernel's arithmetic (no MXU default-precision lowering).
    return jnp.sum(x * w, axis=-1, keepdims=True) + b[0]


if __name__ == "__main__":
    key = jax.random.PRNGKey(0)
    k_x, k_w, k_b, k_x2, k_w2, k_b2 = jax.random.split(key, 6)

    # Small shapes matching the PyTorch module: batch N=16, fea_num F=32.
    N, F = 16, 32
    x = jax.random.normal(k_x, (N, F), dtype=jnp.float32)
    bound = 1.0 / (F ** 0.5)                 # nn.Linear init range U(-1/sqrt(F), 1/sqrt(F))
    w = jax.random.uniform(k_w, (1, F), minval=-bound, maxval=bound, dtype=jnp.float32)
    b = jax.random.uniform(k_b, (1,), minval=-bound, maxval=bound, dtype=jnp.float32)

    y = jax.block_until_ready(linear_forward(x, w, b))
    assert y.shape == (N, 1)
    assert jnp.allclose(y, _reference(x, w, b), atol=1e-5, rtol=1e-5)

    # Second check: multi-tile grid with a ragged (non-divisible) partial last
    # block handled by Pallas masking -- no padding pass in the wrapper.
    N2, F2 = 200, 128
    x2 = jax.random.normal(k_x2, (N2, F2), dtype=jnp.float32)
    bound2 = 1.0 / (F2 ** 0.5)
    w2 = jax.random.uniform(k_w2, (1, F2), minval=-bound2, maxval=bound2, dtype=jnp.float32)
    b2 = jax.random.uniform(k_b2, (1,), minval=-bound2, maxval=bound2, dtype=jnp.float32)

    y2 = jax.block_until_ready(linear_forward(x2, w2, b2, max_tile_rows=64))
    assert y2.shape == (N2, 1)
    assert jnp.allclose(y2, _reference(x2, w2, b2), atol=1e-5, rtol=1e-5)

    print("KERNEL_OK")
</pallas_src>

<mosaic_0001>
module attributes {stable_mosaic.version = 11 : i64} {
  func.func @linear_kernel(%arg0: i32, %arg1: memref<16x32xf32, #tpu.memory_space<vmem>>, %arg2: memref<1x32xf32, #tpu.memory_space<vmem>>, %arg3: memref<1xf32, #tpu.memory_space<smem>>, %arg4: memref<16x1xf32, #tpu.memory_space<vmem>>) attributes {dimension_semantics = [#tpu.dimension_semantics<parallel>], iteration_bounds = array<i64: 1>, scalar_prefetch = 0 : i64, scratch_operands = 0 : i64, tpu.core_type = #tpu.core_type<tc>, window_params = [{transform_indices = @transform_0, window_bounds = array<i64: 16, 32>}, {pipeline_mode = #tpu.pipeline_mode<synchronous>, transform_indices = @transform_1, window_bounds = array<i64: 1, 32>}, {transform_indices = @transform_2, window_bounds = array<i64: 1>}, {transform_indices = @transform_3, window_bounds = array<i64: 16, 1>}]} {
    %c0 = arith.constant 0 : index
    %c0_0 = arith.constant 0 : index
    %0 = vector.load %arg1[%c0, %c0_0] : memref<16x32xf32, #tpu.memory_space<vmem>>, vector<16x32xf32>
    %c0_1 = arith.constant 0 : index
    %c0_2 = arith.constant 0 : index
    %1 = vector.load %arg2[%c0_1, %c0_2] : memref<1x32xf32, #tpu.memory_space<vmem>>, vector<1x32xf32>
    %2 = vector.broadcast %1 : vector<1x32xf32> to vector<16x32xf32>
    %3 = arith.mulf %0, %2 : vector<16x32xf32>
    %cst = arith.constant dense<0.000000e+00> : vector<16xf32>
    %4 = vector.multi_reduction <add>, %3, %cst [1] : vector<16x32xf32> to vector<16xf32>
    %5 = vector.shape_cast %4 : vector<16xf32> to vector<16x1xf32>
    %c0_3 = arith.constant 0 : index
    %6 = memref.load %arg3[%c0_3] : memref<1xf32, #tpu.memory_space<smem>>
    %7 = vector.broadcast %6 : f32 to vector<16x1xf32>
    %8 = arith.addf %5, %7 : vector<16x1xf32>
    %c0_4 = arith.constant 0 : index
    %c0_5 = arith.constant 0 : index
    %9 = vector.load %arg4[%c0_4, %c0_5] : memref<16x1xf32, #tpu.memory_space<vmem>>, vector<16x1xf32>
    tpu.vector_store %arg4[%c0_4, %c0_5], %8 {strides = array<i32>} : memref<16x1xf32, #tpu.memory_space<vmem>>, vector<16x1xf32>,
    return
  }
  func.func @transform_0(%arg0: i32) -> (i32, i32) {
    %c0_i32 = arith.constant 0 : i32
    %c0_i32_0 = arith.constant 0 : i32
    return %arg0, %c0_i32 : i32, i32
  }
  func.func @transform_1(%arg0: i32) -> (i32, i32) {
    %c0_i32 = arith.constant 0 : i32
    %c0_i32_0 = arith.constant 0 : i32
    %c0_i32_1 = arith.constant 0 : i32
    return %c0_i32, %c0_i32_0 : i32, i32
  }
  func.func @transform_2(%arg0: i32) -> i32 {
    %c0_i32 = arith.constant 0 : i32
    %c0_i32_0 = arith.constant 0 : i32
    return %c0_i32 : i32
  }
  func.func @transform_3(%arg0: i32) -> (i32, i32) {
    %c0_i32 = arith.constant 0 : i32
    %c0_i32_0 = arith.constant 0 : i32
    return %arg0, %c0_i32 : i32, i32
  }
}

</mosaic_0001>

<bundles_post_ra>
// kernel: tpu_custom_call.1
= control target key start
LH: loop header
LB: loop body
LE: loop exit
PB: predicated region body
PF: predicated region fallthrough
CT: control target
= control target key end

     0   :  { %9 = vsyncpa [#allocation4], 0  ;;  %s88_s15 = smov [#allocation3]   ;;  %s89_s17 = smov 128   ;;  %s126_s0 = inlined_call_operand.hbm [shape: f32[16,32], index: 0, kind: input, shape index: {}]   ;;  %s127_s1 = inlined_call_operand.vmem [shape: f32[1,32], index: 1, kind: input, shape index: {}]   ;;  %s128_s2 = inlined_call_operand.<no memory space> [shape: f32[1], index: 2, kind: input, shape index: {}]   ;;  %s129_s3 = inlined_call_operand.vmem [shape: f32[16,1], index: 3, kind: output, shape index: {}]  }
   0x1   :  { %s14_s14 = sshll.u32 %s126_s0, 4  ;;  %s16_s16 = sshll.u32 %s88_s15, 4  ;;  %s15_s14 = int_to_ptr.hbm [resolvable:$true] %s14_s14  ;;  %s17_s16 = int_to_ptr.vmem [resolvable:$true] %s16_s16 }
   0x2   :  { %s90_s18 = smov 8  }
   0x3   :  { %22 = dma.hbm_to_vmem [thread:$0]  %s15_s14, 256, %s17_s16, [#allocation4], %s89_s17, %s89_s17, %s90_s18  }
   0x4   :  { %86 = dma.done.wait [#allocation4], 256  }
   0x5   :  { %87 = vsyncadd [#allocation4], 4294967040  ;;  %v31_v0 = vld [vmem:[#allocation3] sm:$0xff]  ;;  %vm39_vm0 = vcmask 261120   ;;  %v32_v3 = vld [vmem:[#allocation3 + $0x8] sm:$0xff]  ;;  %v47_v7 = vstv %s128_s2  ;;  %vm50_vm1 = vcmask 7168  }
   0x6   :  { %v61_v1 = vld [vmem:[%s127_s1] ss:$0 sm:$0xff] }
   0x7   :  { %v37_v2 = vmul.f32 %v61_v1, %v31_v0  ;;  %v38_v5 = vmul.f32 %v61_v1, %v32_v3 }
   0x9   :  { %v40_v4 = vsel %vm39_vm0, %v37_v2, 0.0  ;;  %v43_v6 = vsel %vm39_vm0, %v38_v5, 0.0 }
   0xa   :  { %41 = vadd.xlane.f32.xlu0 %v40_v4 }
  0x12   :  { %44 = vadd.xlane.f32.xlu0 %v43_v6 }
  0x7d   :  { %v42_v8 = vpop.xlane.xlu0 %41 }
  0x7e   :  { %v48_v9 = vadd.f32 %v47_v7, %v42_v8 }
  0x80   :  { %51 = vst.msk [vmem:[%s129_s3] sm:$0xff] %vm50_vm1, %v48_v9 }
  0x85   :  { %v45_v10 = vpop.xlane.xlu0 %44 }
  0x86   :  { %v49_v11 = vadd.f32 %v47_v7, %v45_v10 }
  0x88   :  { %52 = vst.msk [vmem:[%s129_s3 + $0x8] sm:$0xff] %vm50_vm1, %v49_v11 }
  0x89   :  { %57 = vsyncpa [#allocation4], 1 }

</bundles_post_ra>
